<compile_context>
chip_gen: v6e
topology: v6e:2x2x1
jax: 0.10.0
libtpu: 0.0.40
codegen_flags: <defaults>
</compile_context>

<pallas_src>
import jax
import jax.numpy as jnp
from jax import lax
from jax.experimental import pallas as pl
from jax.experimental.pallas import tpu as pltpu

ROW_TILE = 2048            # rows (gaussians / vertices) per grid step
HIDDEN_PAD = 128           # MLP hidden width zero-padded to one full lane group
VMEM_LIMIT_BYTES = 32 * 1024 * 1024   # explicit, safe on v5e/v6e (128 MiB) and v7x (64 MiB)
_OUT_W = 18                # packed output lanes (see kernel 2 docstring)


def _round_up(x, m):
    return -(-x // m) * m


def _row_tile(n):
    """Row tile: multiple of 16 (f32 8-sublane / bf16 16-sublane packing),
    capped at ROW_TILE, and >=2 grid steps once there is enough work so both
    v7x TensorCores are used."""
    if n <= 256:
        return _round_up(max(n, 16), 16)
    half = _round_up(-(-n // 2), 16)
    return min(ROW_TILE, half)


def _pad_rows(x, multiple):
    pad = (-x.shape[0]) % multiple
    if pad:
        x = jnp.pad(x, ((0, pad),) + ((0, 0),) * (x.ndim - 1))
    return x


# ----------------------------------------------------------------------------
# Pallas kernel 1: two-layer MLP  y = relu(x@W1+b1)@W2+b2
# (DeformationField; the broadcast cond rows of W1 are pre-folded into b1.)
# ----------------------------------------------------------------------------
def _mlp_kernel(x_ref, w1_ref, b1_ref, w2_ref, b2_ref, o_ref):
    h = jnp.dot(x_ref[...], w1_ref[...], preferred_element_type=jnp.float32)
    h = jnp.maximum(h + b1_ref[...], 0.0)
    o_ref[...] = (jnp.dot(h, w2_ref[...], preferred_element_type=jnp.float32)
                  + b2_ref[...])


def mlp_forward(x, w1, b1, w2, b2):
    n, d_in = x.shape
    d_h = w1.shape[1]
    d_out = w2.shape[1]
    tile = _row_tile(n)
    xp = _pad_rows(x, tile)
    n_pad = xp.shape[0]
    out = pl.pallas_call(
        _mlp_kernel,
        out_shape=jax.ShapeDtypeStruct((n_pad, d_out), jnp.float32),
        grid_spec=pltpu.PrefetchScalarGridSpec(
            num_scalar_prefetch=0,
            grid=(n_pad // tile,),
            in_specs=[
                pl.BlockSpec((tile, d_in), lambda i: (i, 0)),
                pl.BlockSpec((d_in, d_h), lambda i: (0, 0)),
                pl.BlockSpec((1, d_h), lambda i: (0, 0)),
                pl.BlockSpec((d_h, d_out), lambda i: (0, 0)),
                pl.BlockSpec((1, d_out), lambda i: (0, 0)),
            ],
            out_specs=pl.BlockSpec((tile, d_out), lambda i: (i, 0)),
        ),
        compiler_params=pltpu.CompilerParams(
            dimension_semantics=("parallel",),
            vmem_limit_bytes=VMEM_LIMIT_BYTES),
    )(xp, w1, b1, w2, b2)
    return out[:n]


# ----------------------------------------------------------------------------
# Pallas kernel 2: fused CanonicalField MLP + gaussian head + ColorField MLP
#
# Per-row input streams (each lane-0 aligned, tiled over rows):
#   fpts  (N, 9)   deformed face vertices [v0|v1|v2]
#   ib    (N, 3)   init_barys
#   rot   (N, 4)   raw quaternion parameter
#   scl   (N, 3)   raw log-scale parameter
#   feat  (N, nc)  color features (bfloat16 transport)
#
# Constant (fetched once) weight blocks; layer-1 weights row-split per field so
# layer 1 is a sum of dots (no lane concatenation in the kernel):
#   canon: w1a_rot (4,H) w1a_scl (3,H) w1a_ib (3,H) b1a (1,H) w2a (H,10) b2a (1,10)
#   color: w1c_feat (nc,H) w1c_vd (3,H) b1c (1,H) w2c (H,4) b2c (1,4)
#   cam   (1, 3)
#
# Packed output slab (18 lanes, single lane-dense store):
#   [0:3] means3D  [3:6] canonical_means3D  [6:9] scales  [9:13] rotations
#   [13:16] rgb    [16:17] opacity          [17:18] mean(scales^2) per row
# ----------------------------------------------------------------------------
def _fused_gaussian_kernel(fpts_ref, ib_ref, rot_ref, scl_ref, feat_ref,
                           w1ar_ref, w1as_ref, w1ab_ref, b1a_ref, w2a_ref,
                           b2a_ref,
                           w1cf_ref, w1cv_ref, b1c_ref, w2c_ref, b2c_ref,
                           cam_ref, o_ref):
    fpts = fpts_ref[...]
    ib = ib_ref[...]
    rot = rot_ref[...]
    scl = scl_ref[...]
    feat = feat_ref[...].astype(jnp.float32)

    fp0 = fpts[:, 0:3]
    fp1 = fpts[:, 3:6]
    fp2 = fpts[:, 6:9]

    # --- activations (rsqrt * x  instead of x / sqrt) ---
    rot_act = rot * lax.rsqrt(
        jnp.maximum(jnp.sum(rot * rot, axis=-1, keepdims=True), 1e-24))
    scl_act = jnp.exp(scl)

    # --- CanonicalField MLP (cond rows of W1 pre-folded into b1a) ---
    h = (jnp.dot(rot_act, w1ar_ref[...], preferred_element_type=jnp.float32)
         + jnp.dot(scl_act, w1as_ref[...], preferred_element_type=jnp.float32)
         + jnp.dot(ib, w1ab_ref[...], preferred_element_type=jnp.float32)
         + b1a_ref[...])
    h = jnp.maximum(h, 0.0)
    canon = (jnp.dot(h, w2a_ref[...], preferred_element_type=jnp.float32)
             + b2a_ref[...])                                      # (tile, 10)
    delta_bary = canon[:, 0:3]
    delta_rot = canon[:, 3:7]
    delta_scale = canon[:, 7:10]

    # --- Gaussian head ---
    cb = ib + delta_bary
    means = fp0 * cb[:, 0:1] + fp1 * cb[:, 1:2] + fp2 * cb[:, 2:3]
    cmeans = fp0 * ib[:, 0:1] + fp1 * ib[:, 1:2] + fp2 * ib[:, 2:3]

    dirs = means - cam_ref[...]
    vdirs = dirs * lax.rsqrt(
        jnp.maximum(jnp.sum(dirs * dirs, axis=-1, keepdims=True), 1e-24))

    scales = jnp.exp(scl + delta_scale)
    r = rot + delta_rot
    rots = r * lax.rsqrt(
        jnp.maximum(jnp.sum(r * r, axis=-1, keepdims=True), 1e-24))

    scale_sq = jnp.mean(scales * scales, axis=-1, keepdims=True)

    # --- ColorField MLP (cond / frame / camera rows pre-folded into b1c) ---
    hc = (jnp.dot(feat, w1cf_ref[...], preferred_element_type=jnp.float32)
          + jnp.dot(vdirs, w1cv_ref[...], preferred_element_type=jnp.float32)
          + b1c_ref[...])
    hc = jnp.maximum(hc, 0.0)
    logits = (jnp.dot(hc, w2c_ref[...], preferred_element_type=jnp.float32)
              + b2c_ref[...])                                     # (tile, 4)
    col = pl.reciprocal(1.0 + jnp.exp(-logits), approx=True)      # sigmoid

    # --- single lane-dense store of the whole 18-lane row ---
    o_ref[...] = jnp.concatenate(
        [means, cmeans, scales, rots, col, scale_sq], axis=-1)


def fused_gaussian_forward(fpts, init_barys, rotation, scaling, colors_feat,
                           canon_w, color_w, cam_pos):
    n = fpts.shape[0]
    nc = colors_feat.shape[1]
    w1a_rot, w1a_scl, w1a_ib, b1a, w2a, b2a = canon_w
    w1c_feat, w1c_vd, b1c, w2c, b2c = color_w

    tile = _row_tile(n)
    fpts_p = _pad_rows(fpts, tile)
    ib_p = _pad_rows(init_barys, tile)
    rot_p = _pad_rows(rotation, tile)
    scl_p = _pad_rows(scaling, tile)
    feat_p = _pad_rows(colors_feat.astype(jnp.bfloat16), tile)  # bf16 transport
    n_pad = fpts_p.shape[0]

    def row_spec(width):
        return pl.BlockSpec((tile, width), lambda i: (i, 0))

    def const_spec(arr):
        return pl.BlockSpec(arr.shape, lambda i: (0, 0))

    out = pl.pallas_call(
        _fused_gaussian_kernel,
        out_shape=jax.ShapeDtypeStruct((n_pad, _OUT_W), jnp.float32),
        grid_spec=pltpu.PrefetchScalarGridSpec(
            num_scalar_prefetch=0,
            grid=(n_pad // tile,),
            in_specs=[
                row_spec(9), row_spec(3), row_spec(4), row_spec(3),
                row_spec(nc),
                const_spec(w1a_rot), const_spec(w1a_scl), const_spec(w1a_ib),
                const_spec(b1a), const_spec(w2a), const_spec(b2a),
                const_spec(w1c_feat), const_spec(w1c_vd),
                const_spec(b1c), const_spec(w2c), const_spec(b2c),
                const_spec(cam_pos),
            ],
            out_specs=pl.BlockSpec((tile, _OUT_W), lambda i: (i, 0)),
        ),
        compiler_params=pltpu.CompilerParams(
            dimension_semantics=("parallel",),
            vmem_limit_bytes=VMEM_LIMIT_BYTES),
    )(fpts_p, ib_p, rot_p, scl_p, feat_p,
      w1a_rot, w1a_scl, w1a_ib, b1a, w2a, b2a,
      w1c_feat, w1c_vd, b1c, w2c, b2c, cam_pos)
    return out[:n]


# ----------------------------------------------------------------------------
# Parameter construction (deterministic, synthetic — mirrors MeshNet.__init__)
# ----------------------------------------------------------------------------
def _mlp_params(key, d_in, d_h, d_out, d_h_pad=HIDDEN_PAD):
    k1, k2, k3, k4 = jax.random.split(key, 4)
    s1 = 1.0 / jnp.sqrt(d_in)
    s2 = 1.0 / jnp.sqrt(d_h)
    w1 = jax.random.uniform(k1, (d_in, d_h), jnp.float32, -s1, s1)
    b1 = jax.random.uniform(k2, (1, d_h), jnp.float32, -s1, s1)
    w2 = jax.random.uniform(k3, (d_h, d_out), jnp.float32, -s2, s2)
    b2 = jax.random.uniform(k4, (1, d_out), jnp.float32, -s2, s2)
    # Zero-pad hidden dim to a full 128-lane width: padded units see zero
    # weights and bias, relu(0)=0, zero W2 rows contribute nothing — identical.
    pad = d_h_pad - d_h
    w1 = jnp.pad(w1, ((0, 0), (0, pad)))
    b1 = jnp.pad(b1, ((0, 0), (0, pad)))
    w2 = jnp.pad(w2, ((0, pad), (0, 0)))
    return (w1, b1, w2, b2)


def init_params(key, *, n_verts, n_faces, n_color_features, cond_dim,
                frame_dim, cam_dim, hidden):
    ks = jax.random.split(key, 10)
    template_vertices = jax.random.normal(ks[0], (n_verts, 3), jnp.float32) * 0.5
    # deterministic triangle indices
    face_ids = ((jnp.arange(n_faces * 3, dtype=jnp.int32).reshape(n_faces, 3) * 7 + 1)
                % n_verts)
    init_barys = jax.nn.softmax(jax.random.normal(ks[1], (n_faces, 3)), axis=-1)

    # init_rotations: identity-ish quaternions (w,x,y,z)
    rotation = jnp.concatenate(
        [jnp.ones((n_faces, 1), jnp.float32),
         0.01 * jax.random.normal(ks[2], (n_faces, 3), jnp.float32)], axis=1)

    # scaling init: log(sqrt(clamp_min(dist2, 1e-7))) repeated over 3 axes
    # TODO(synk): distCUDA2 (3-NN mean sq distance) has no clean equivalent;
    #             use a deterministic neighbor-distance proxy.
    init_points = jnp.einsum('ikj,ik->ij',
                             template_vertices[face_ids], init_barys)
    dist2 = jnp.clip(
        jnp.sum((init_points - jnp.roll(init_points, 1, axis=0)) ** 2, axis=-1),
        1e-7, None)
    scaling = jnp.log(jnp.sqrt(dist2))[:, None].repeat(3, axis=1)

    colors_feat = jax.random.uniform(ks[3], (n_faces, n_color_features),
                                     jnp.float32) * 0.33

    # TODO(synk): CageSmpl / LBS skinning is an external asset-driven module;
    #             stand-in is a linear projection of the lbs vector.
    lbs_proj = jax.random.normal(ks[4], (cond_dim, 3), jnp.float32) * 0.1

    d_canon_in = 4 + 3 + 3 + cond_dim
    d_color_in = n_color_features + cond_dim + 3 + frame_dim + cam_dim
    return {
        'template_vertices': template_vertices,
        'face_ids': face_ids,
        'init_barys': init_barys,
        'rotation': rotation,
        'scaling': scaling,
        'colors_feat': colors_feat,
        'lbs_proj': lbs_proj,
        'silhouette_color': jnp.array([1.0, 0.0, 0.0], jnp.float32),  # 'red'
        'deform_mlp': _mlp_params(ks[5], 3 + cond_dim, hidden, 3),
        'canon_mlp': _mlp_params(ks[6], d_canon_in, hidden, 10),
        'color_mlp': _mlp_params(ks[7], d_color_in, hidden, 4),
    }


# ----------------------------------------------------------------------------
# MeshNet.forward
# ----------------------------------------------------------------------------
def mesh_net_forward(params, batch):
    lbs = batch['lbs']                       # (cond_dim,)
    cond = lbs                               # get_cond(): not the 'face' cage
    canon_points = params['template_vertices']      # (V, 3)
    face_ids = params['face_ids']                    # (N, 3) int32
    init_barys = params['init_barys']                # (N, 3)
    N = init_barys.shape[0]

    # TODO(synk): geometry.get() (tet-cage LBS) is undefined upstream; synthetic.
    def geometry_get(lbs_vec, delta=None):
        pts = canon_points if delta is None else canon_points + delta
        offset = jnp.tanh(lbs_vec @ params['lbs_proj'])       # (3,)
        return pts + offset[None, :]

    input_points = geometry_get(lbs)

    # --- DeformationField (Pallas MLP); broadcast cond rows folded into bias ---
    w1d, b1d, w2d, b2d = params['deform_mlp']
    b1d_eff = b1d + cond[None, :] @ w1d[3:]
    delta_node = mlp_forward(canon_points, w1d[:3], b1d_eff, w2d, b2d)

    # deformed tet points, gather face vertices (glue)
    points = geometry_get(lbs, delta=delta_node)
    fpts = points[face_ids].reshape(N, 9)                     # fp0 | fp1 | fp2

    # --- CanonicalField weights: split layer-1 per field, fold cond into bias ---
    w1a, b1a, w2a, b2a = params['canon_mlp']
    b1a_eff = b1a + cond[None, :] @ w1a[10:]
    canon_w = (w1a[0:4], w1a[4:7], w1a[7:10], b1a_eff, w2a, b2a)

    # --- ColorField weights: split layer-1, fold cond/frame/camera into bias ---
    w1c, b1c, w2c, b2c = params['color_mlp']
    nc = params['colors_feat'].shape[1]
    cd = cond.shape[0]
    fd = batch['frame_encoding'].shape[0]
    o1 = nc + cd          # start of viewdirs rows
    o2 = o1 + 3           # start of frame-encoding rows
    o3 = o2 + fd          # start of camera-encoding rows
    b1c_eff = (b1c
               + cond[None, :] @ w1c[nc:o1]
               + batch['frame_encoding'][None, :] @ w1c[o2:o3]
               + batch['camera_encoding'][None, :] @ w1c[o3:])
    color_w = (w1c[:nc], w1c[o1:o2], b1c_eff, w2c, b2c)

    cam_pos = batch['camera_center'][None, :]                    # (1, 3)

    packed = fused_gaussian_forward(
        fpts, init_barys, params['rotation'], params['scaling'],
        params['colors_feat'], canon_w, color_w, cam_pos)

    means3D = packed[:, 0:3]
    canonical_means3D = packed[:, 3:6]
    scales = packed[:, 6:9]
    rotations = packed[:, 9:13]
    rgb = packed[:, 13:16]
    opacities = packed[:, 16:17]
    scale_energy = jnp.mean(packed[:, 17])[None]

    silhouette_rgb = jnp.broadcast_to(params['silhouette_color'][None, :], (N, 3))

    return {
        'shs': None,
        'rgb': rgb,
        'scales': scales,
        'rotations': rotations,
        'opacities': opacities,
        'silhouette_rgb': silhouette_rgb,
        'means3D': means3D,
        'canonical_means3D': canonical_means3D,
        'color_feat': params['colors_feat'],
        'fm_energy': jnp.array([0.0], jnp.float32),
        'scale_energy': scale_energy,
        'geometry': {
            'name': 'body',
            'input_tetpoints': input_points,
            'canon_tetpoints': canon_points,
            'delta_node': jax.lax.stop_gradient(delta_node),
            'deformed_tetpoints': points,
            'faces': face_ids[None],
        },
    }


# ----------------------------------------------------------------------------
if __name__ == "__main__":
    key = jax.random.PRNGKey(0)
    kp, kb1, kb2, kb3, kb4 = jax.random.split(key, 5)

    n_verts, n_faces = 64, 64
    n_color_features, cond_dim, frame_dim, cam_dim, hidden = 16, 16, 8, 8, 32

    params = init_params(kp, n_verts=n_verts, n_faces=n_faces,
                         n_color_features=n_color_features, cond_dim=cond_dim,
                         frame_dim=frame_dim, cam_dim=cam_dim, hidden=hidden)

    batch = {
        'lbs': jax.random.normal(kb1, (cond_dim,), jnp.float32),
        'frame_encoding': jax.random.normal(kb2, (frame_dim,), jnp.float32),
        'camera_encoding': jax.random.normal(kb3, (cam_dim,), jnp.float32),
        'camera_center': jax.random.normal(kb4, (3,), jnp.float32) * 2.0,
    }

    out = mesh_net_forward(params, batch)
    jax.block_until_ready((out['rgb'], out['opacities'], out['means3D'],
                           out['canonical_means3D'], out['scales'],
                           out['rotations'], out['scale_energy'],
                           out['geometry']['deformed_tetpoints']))
    print("KERNEL_OK")
</pallas_src>

<mosaic_0001>
module attributes {stable_mosaic.version = 11 : i64} {
  func.func @_mlp_kernel(%arg0: i32, %arg1: memref<64x3xf32, #tpu.memory_space<vmem>>, %arg2: memref<3x128xf32, #tpu.memory_space<vmem>>, %arg3: memref<1x128xf32, #tpu.memory_space<vmem>>, %arg4: memref<128x3xf32, #tpu.memory_space<vmem>>, %arg5: memref<1x3xf32, #tpu.memory_space<vmem>>, %arg6: memref<64x3xf32, #tpu.memory_space<vmem>>) attributes {dimension_semantics = [#tpu.dimension_semantics<parallel>], iteration_bounds = array<i64: 1>, scalar_prefetch = 0 : i64, scratch_operands = 0 : i64, tpu.core_type = #tpu.core_type<tc>, window_params = [{transform_indices = @transform_0, window_bounds = array<i64: 64, 3>}, {pipeline_mode = #tpu.pipeline_mode<synchronous>, transform_indices = @transform_1, window_bounds = array<i64: 3, 128>}, {pipeline_mode = #tpu.pipeline_mode<synchronous>, transform_indices = @transform_2, window_bounds = array<i64: 1, 128>}, {pipeline_mode = #tpu.pipeline_mode<synchronous>, transform_indices = @transform_3, window_bounds = array<i64: 128, 3>}, {pipeline_mode = #tpu.pipeline_mode<synchronous>, transform_indices = @transform_4, window_bounds = array<i64: 1, 3>}, {transform_indices = @transform_5, window_bounds = array<i64: 64, 3>}]} {
    %c0 = arith.constant 0 : index
    %c0_0 = arith.constant 0 : index
    %0 = vector.load %arg1[%c0, %c0_0] : memref<64x3xf32, #tpu.memory_space<vmem>>, vector<64x3xf32>
    %c0_1 = arith.constant 0 : index
    %c0_2 = arith.constant 0 : index
    %1 = vector.load %arg2[%c0_1, %c0_2] : memref<3x128xf32, #tpu.memory_space<vmem>>, vector<3x128xf32>
    %cst = arith.constant dense<0.000000e+00> : vector<64x128xf32>
    %2 = tpu.matmul %0, %1, %cst {dimension_numbers = #tpu.dot_dimension_numbers<[1], [0], [0], [1], [0, 0, 1, 1], [], []>} : vector<64x3xf32>, vector<3x128xf32>, vector<64x128xf32> -> vector<64x128xf32>
    %c0_3 = arith.constant 0 : index
    %c0_4 = arith.constant 0 : index
    %3 = vector.load %arg3[%c0_3, %c0_4] : memref<1x128xf32, #tpu.memory_space<vmem>>, vector<1x128xf32>
    %4 = vector.broadcast %3 : vector<1x128xf32> to vector<64x128xf32>
    %5 = arith.addf %2, %4 : vector<64x128xf32>
    %cst_5 = arith.constant 0.000000e+00 : f32
    %6 = vector.broadcast %cst_5 : f32 to vector<64x128xf32>
    %7 = arith.maximumf %5, %6 : vector<64x128xf32>
    %c0_6 = arith.constant 0 : index
    %c0_7 = arith.constant 0 : index
    %8 = vector.load %arg4[%c0_6, %c0_7] : memref<128x3xf32, #tpu.memory_space<vmem>>, vector<128x3xf32>
    %cst_8 = arith.constant dense<0.000000e+00> : vector<64x3xf32>
    %9 = tpu.matmul %7, %8, %cst_8 {dimension_numbers = #tpu.dot_dimension_numbers<[1], [0], [0], [1], [0, 0, 1, 1], [], []>} : vector<64x128xf32>, vector<128x3xf32>, vector<64x3xf32> -> vector<64x3xf32>
    %c0_9 = arith.constant 0 : index
    %c0_10 = arith.constant 0 : index
    %10 = vector.load %arg5[%c0_9, %c0_10] : memref<1x3xf32, #tpu.memory_space<vmem>>, vector<1x3xf32>
    %11 = vector.broadcast %10 : vector<1x3xf32> to vector<64x3xf32>
    %12 = arith.addf %9, %11 : vector<64x3xf32>
    %c0_11 = arith.constant 0 : index
    %c0_12 = arith.constant 0 : index
    %13 = vector.load %arg6[%c0_11, %c0_12] : memref<64x3xf32, #tpu.memory_space<vmem>>, vector<64x3xf32>
    tpu.vector_store %arg6[%c0_11, %c0_12], %12 {strides = array<i32>} : memref<64x3xf32, #tpu.memory_space<vmem>>, vector<64x3xf32>,
    return
  }
  func.func @transform_0(%arg0: i32) -> (i32, i32) {
    %c0_i32 = arith.constant 0 : i32
    %c0_i32_0 = arith.constant 0 : i32
    return %arg0, %c0_i32 : i32, i32
  }
  func.func @transform_1(%arg0: i32) -> (i32, i32) {
    %c0_i32 = arith.constant 0 : i32
    %c0_i32_0 = arith.constant 0 : i32
    %c0_i32_1 = arith.constant 0 : i32
    return %c0_i32, %c0_i32_0 : i32, i32
  }
  func.func @transform_2(%arg0: i32) -> (i32, i32) {
    %c0_i32 = arith.constant 0 : i32
    %c0_i32_0 = arith.constant 0 : i32
    %c0_i32_1 = arith.constant 0 : i32
    return %c0_i32, %c0_i32_0 : i32, i32
  }
  func.func @transform_3(%arg0: i32) -> (i32, i32) {
    %c0_i32 = arith.constant 0 : i32
    %c0_i32_0 = arith.constant 0 : i32
    %c0_i32_1 = arith.constant 0 : i32
    return %c0_i32, %c0_i32_0 : i32, i32
  }
  func.func @transform_4(%arg0: i32) -> (i32, i32) {
    %c0_i32 = arith.constant 0 : i32
    %c0_i32_0 = arith.constant 0 : i32
    %c0_i32_1 = arith.constant 0 : i32
    return %c0_i32, %c0_i32_0 : i32, i32
  }
  func.func @transform_5(%arg0: i32) -> (i32, i32) {
    %c0_i32 = arith.constant 0 : i32
    %c0_i32_0 = arith.constant 0 : i32
    return %arg0, %c0_i32 : i32, i32
  }
}

</mosaic_0001>

<bundles_post_ra>
// kernel: tpu_custom_call.1
= control target key start
LH: loop header
LB: loop body
LE: loop exit
PB: predicated region body
PF: predicated region fallthrough
CT: control target
= control target key end

     0   :  { %vm61_vm0 = vcmask 1042432   ;;  %vm36_vm1 = vcmask 23552   ;;  %s603_s1 = inlined_call_operand.vmem [shape: f32[3,128], index: 1, kind: input, shape index: {}]   ;;  %s604_s0 = inlined_call_operand.vmem [shape: f32[64,3], index: 0, kind: input, shape index: {}]   ;;  %s605_s3 = inlined_call_operand.vmem [shape: f32[128,3], index: 3, kind: input, shape index: {}]   ;;  %s606_s2 = inlined_call_operand.vmem [shape: f32[1,128], index: 2, kind: input, shape index: {}]   ;;  %s607_s4 = inlined_call_operand.vmem [shape: f32[1,3], index: 4, kind: input, shape index: {}]   ;;  %s608_s5 = inlined_call_operand.vmem [shape: f32[64,3], index: 5, kind: output, shape index: {}]  }
   0x1   :  { %v28_v0 = vld [vmem:[%s603_s1] sm:$0x7]  ;;  %v21_v2 = vld [vmem:[%s604_s0 + $0x8] sm:$0xff]  ;;  %v22_v3 = vld [vmem:[%s604_s0 + $0x10] sm:$0xff] }
   0x2   :  { %v20_v1 = vld [vmem:[%s604_s0] sm:$0xff]  ;;  %362 = vmatprep.subr.msk.mxu0 %vm61_vm0, %v28_v0  ;;  %v193_v4 = vld [vmem:[%s605_s3 + $0x78] sm:$0xff]  ;;  %v192_v5 = vld [vmem:[%s605_s3 + $0x70] sm:$0xff] }
   0x3   :  { %364 = vmatprep.mubr.msk.f32.mxu0 %vm36_vm1, %v20_v1  ;;  %363 = vmatpush3.msk.msra.mxu0 %vm61_vm0, %v28_v0  ;;  %v23_v6 = vld [vmem:[%s604_s0 + $0x18] sm:$0xff]  ;;  %v24_v7 = vld [vmem:[%s604_s0 + $0x20] sm:$0xff]  ;;  %v191_v8 = vld [vmem:[%s605_s3 + $0x68] sm:$0xff] }
   0x4   :  { %365 = vmatmul.mubr.msk.f32.vlgmr.msra.gmra.mxu0 %vm36_vm1, %v21_v2  ;;  %376 = vmatprep.subr.mxu0 %v193_v4  ;;  %v25_v9 = vld [vmem:[%s604_s0 + $0x28] sm:$0xff]  ;;  %v190_v10 = vld [vmem:[%s605_s3 + $0x60] sm:$0xff]  ;;  %v26_v11 = vld [vmem:[%s604_s0 + $0x30] sm:$0xff] }
   0x5   :  { %367 = vmatprep.mubr.msk.f32.mxu0 %vm36_vm1, %v22_v3  ;;  %377 = vmatpush3.msra.mxu0 %v193_v4  ;;  %v189_v12 = vld [vmem:[%s605_s3 + $0x58] sm:$0xff]  ;;  %v188_v14 = vld [vmem:[%s605_s3 + $0x50] sm:$0xff]  ;;  %v187_v15 = vld [vmem:[%s605_s3 + $0x48] sm:$0xff] }
   0x6   :  { %420 = vmatprep.subr.mxu1 %v193_v4  ;;  %378 = vmatprep.subr.mxu0 %v192_v5  ;;  %v27_v13 = vld [vmem:[%s604_s0 + $0x38] sm:$0xff]  ;;  %v186_v16 = vld [vmem:[%s605_s3 + $0x40] sm:$0xff]  ;;  %v184_v18 = vld [vmem:[%s605_s3 + $0x30] sm:$0xff] }
   0x7   :  { %436 = vmatpush3.msra.mxu1 %v193_v4  ;;  %379 = vmatpush3.msra.mxu0 %v192_v5  ;;  %v185_v17 = vld [vmem:[%s605_s3 + $0x38] sm:$0xff]  ;;  %v183_v19 = vld [vmem:[%s605_s3 + $0x28] sm:$0xff]  ;;  %v182_v20 = vld [vmem:[%s605_s3 + $0x20] sm:$0xff] }
   0x8   :  { %368 = vmatmul.mubr.msk.f32.gmra.mxu0 %vm36_vm1, %v23_v6  ;;  %421 = vmatprep.subr.mxu1 %v192_v5  ;;  %v181_v21 = vld [vmem:[%s605_s3 + $0x18] sm:$0xff]  ;;  %v180_v22 = vld [vmem:[%s605_s3 + $0x10] sm:$0xff]  ;;  %v179_v23 = vld [vmem:[%s605_s3 + $0x8] sm:$0xff] }
   0x9   :  { %370 = vmatprep.mubr.msk.f32.mxu0 %vm36_vm1, %v24_v7  ;;  %380 = vmatprep.subr.mxu0 %v191_v8  ;;  %v178_v24 = vld [vmem:[%s605_s3] sm:$0xff] }
   0xa   :  { %437 = vmatpush3.msra.mxu1 %v192_v5  ;;  %381 = vmatpush3.msra.mxu0 %v191_v8  ;;  %v318_v25 = vld [vmem:[%s606_s2] ss:$0 sm:$0xff] }
   0xb   :  { %422 = vmatprep.subr.mxu1 %v191_v8  ;;  %382 = vmatprep.subr.mxu0 %v190_v10  ;;  %v328_v50 = vld [vmem:[%s607_s4] ss:$0 sm:$0xff] }
   0xc   :  { %371 = vmatmul.mubr.msk.f32.gmra.mxu0 %vm36_vm1, %v25_v9  ;;  %438 = vmatpush3.msra.mxu1 %v191_v8 }
   0xd   :  { %373 = vmatprep.mubr.msk.f32.mxu0 %vm36_vm1, %v26_v11  ;;  %383 = vmatpush3.msra.mxu0 %v190_v10 }
   0xe   :  { %384 = vmatprep.subr.mxu0 %v189_v12  ;;  %423 = vmatprep.subr.mxu1 %v190_v10 }
   0xf   :  { %385 = vmatpush3.msra.mxu0 %v189_v12  ;;  %439 = vmatpush3.msra.mxu1 %v190_v10 }
  0x10   :  { %374 = vmatmul.mubr.msk.f32.gmra.mxu0 %vm36_vm1, %v27_v13  ;;  %386 = vmatprep.subr.mxu0 %v188_v14 }
  0x11   :  { %387 = vmatpush3.msra.mxu0 %v188_v14  ;;  %424 = vmatprep.subr.mxu1 %v189_v12 }
  0x12   :  { %388 = vmatprep.subr.mxu0 %v187_v15  ;;  %440 = vmatpush3.msra.mxu1 %v189_v12 }
  0x13   :  { %389 = vmatpush3.msra.mxu0 %v187_v15  ;;  %425 = vmatprep.subr.mxu1 %v188_v14 }
  0x14   :  { %390 = vmatprep.subr.mxu0 %v186_v16  ;;  %441 = vmatpush3.msra.mxu1 %v188_v14 }
  0x15   :  { %391 = vmatpush3.msra.mxu0 %v186_v16  ;;  %426 = vmatprep.subr.mxu1 %v187_v15 }
  0x16   :  { %392 = vmatprep.subr.mxu0 %v185_v17  ;;  %442 = vmatpush3.msra.mxu1 %v187_v15 }
  0x17   :  { %393 = vmatpush3.msra.mxu0 %v185_v17  ;;  %427 = vmatprep.subr.mxu1 %v186_v16 }
  0x18   :  { %394 = vmatprep.subr.mxu0 %v184_v18  ;;  %443 = vmatpush3.msra.mxu1 %v186_v16 }
  0x19   :  { %395 = vmatpush3.msra.mxu0 %v184_v18  ;;  %428 = vmatprep.subr.mxu1 %v185_v17 }
  0x1a   :  { %396 = vmatprep.subr.mxu0 %v183_v19  ;;  %444 = vmatpush3.msra.mxu1 %v185_v17 }
  0x1b   :  { %397 = vmatpush3.msra.mxu0 %v183_v19  ;;  %429 = vmatprep.subr.mxu1 %v184_v18 }
  0x1c   :  { %398 = vmatprep.subr.mxu0 %v182_v20  ;;  %445 = vmatpush3.msra.mxu1 %v184_v18 }
  0x1d   :  { %399 = vmatpush3.msra.mxu0 %v182_v20  ;;  %430 = vmatprep.subr.mxu1 %v183_v19 }
  0x1e   :  { %446 = vmatpush3.msra.mxu1 %v183_v19  ;;  %400 = vmatprep.subr.mxu0 %v181_v21 }
  0x1f   :  { %431 = vmatprep.subr.mxu1 %v182_v20  ;;  %401 = vmatpush3.msra.mxu0 %v181_v21 }
  0x20   :  { %447 = vmatpush3.msra.mxu1 %v182_v20  ;;  %402 = vmatprep.subr.mxu0 %v180_v22 }
  0x21   :  { %432 = vmatprep.subr.mxu1 %v181_v21  ;;  %403 = vmatpush3.msra.mxu0 %v180_v22 }
  0x22   :  { %448 = vmatpush3.msra.mxu1 %v181_v21  ;;  %404 = vmatprep.subr.mxu0 %v179_v23 }
  0x23   :  { %433 = vmatprep.subr.mxu1 %v180_v22  ;;  %405 = vmatpush3.msra.mxu0 %v179_v23 }
  0x24   :  { %449 = vmatpush3.msra.mxu1 %v180_v22  ;;  %406 = vmatprep.subr.mxu0 %v178_v24 }
  0x25   :  { %434 = vmatprep.subr.mxu1 %v179_v23  ;;  %407 = vmatpush3.msra.mxu0 %v178_v24 }
  0x26   :  { %450 = vmatpush3.msra.mxu1 %v179_v23 }
  0x27   :  { %435 = vmatprep.subr.mxu1 %v178_v24 }
  0x28   :  { %451 = vmatpush3.msra.mxu1 %v178_v24 }
  0xc4   :  { %v366_v26 = vpop.f32.mrf.mxu0 }
  0xc5   :  { %v137_v27 = vadd.f32 %v366_v26, %v318_v25 }
  0xc6   :  { %v131_v28 = vpop.f32.mrf.mxu0 }
  0xc7   :  { %v132_v29 = vadd.f32 %v318_v25, %v131_v28  ;;  %v171_v32 = vmax.f32 %v137_v27, 0.0 }
  0xc8   :  { %v369_v30 = vpop.f32.mrf.mxu0 }
  0xc9   :  { %v170_v31 = vmax.f32 %v132_v29, 0.0  ;;  %v147_v33 = vadd.f32 %v369_v30, %v318_v25 }
  0xca   :  { %v141_v34 = vpop.f32.mrf.mxu0 }
  0xcb   :  { %408 = vmatprep.mubr.f32.mxu0 %v170_v31  ;;  %v142_v35 = vadd.f32 %v318_v25, %v141_v34  ;;  %v173_v38 = vmax.f32 %v147_v33, 0.0 }
  0xcc   :  { %v372_v36 = vpop.f32.mrf.mxu0  ;;  %409 = vmatmul.mubr.f32.vlgmr.msra.gmra.mxu0 %v171_v32 }
  0xcd   :  { %v172_v37 = vmax.f32 %v142_v35, 0.0  ;;  %v157_v39 = vadd.f32 %v372_v36, %v318_v25 }
  0xce   :  { %v151_v40 = vpop.f32.mrf.mxu0 }
  0xcf   :  { %v152_v41 = vadd.f32 %v318_v25, %v151_v40  ;;  %411 = vmatprep.mubr.f32.mxu1 %v172_v37  ;;  %v175_v44 = vmax.f32 %v157_v39, 0.0 }
  0xd0   :  { %v375_v42 = vpop.f32.mrf.mxu0  ;;  %412 = vmatmul.mubr.f32.vlgmr.msra.gmra.mxu1 %v173_v38 }
  0xd1   :  { %v174_v43 = vmax.f32 %v152_v41, 0.0  ;;  %v167_v45 = vadd.f32 %v375_v42, %v318_v25 }
  0xd2   :  { %v161_v46 = vpop.f32.mrf.mxu0 }
  0xd3   :  { %v162_v47 = vadd.f32 %v318_v25, %v161_v46  ;;  %414 = vmatprep.mubr.f32.mxu1 %v174_v43  ;;  %v177_v49 = vmax.f32 %v167_v45, 0.0 }
  0xd4   :  { %415 = vmatmul.mubr.f32.gmra.mxu1 %v175_v44 }
  0xd5   :  { %v176_v48 = vmax.f32 %v162_v47, 0.0 }
  0xd7   :  { %417 = vmatprep.mubr.f32.mxu1 %v176_v48 }
  0xd8   :  { %418 = vmatmul.mubr.f32.gmra.mxu1 %v177_v49 }
 0x18c   :  { %v410_v51 = vpop.f32.mrf.mxu0 }
 0x18d   :  { %v273_v52 = vadd.f32 %v410_v51, %v328_v50 }
 0x18e   :  { %v267_v53 = vpop.f32.mrf.mxu0 }
 0x18f   :  { %307 = vst.msk [vmem:[%s608_s5 + $0x8] sm:$0xff] %vm36_vm1, %v273_v52  ;;  %v268_v54 = vadd.f32 %v328_v50, %v267_v53 }
 0x190   :  { %v413_v55 = vpop.f32.mrf.mxu1 }
 0x191   :  { %306 = vst.msk [vmem:[%s608_s5] sm:$0xff] %vm36_vm1, %v268_v54  ;;  %v283_v56 = vadd.f32 %v413_v55, %v328_v50 }
 0x192   :  { %v277_v57 = vpop.f32.mrf.mxu1 }
 0x193   :  { %309 = vst.msk [vmem:[%s608_s5 + $0x18] sm:$0xff] %vm36_vm1, %v283_v56  ;;  %v278_v58 = vadd.f32 %v328_v50, %v277_v57 }
 0x194   :  { %v416_v59 = vpop.f32.mrf.mxu1 }
 0x195   :  { %308 = vst.msk [vmem:[%s608_s5 + $0x10] sm:$0xff] %vm36_vm1, %v278_v58  ;;  %v293_v60 = vadd.f32 %v416_v59, %v328_v50 }
 0x196   :  { %v287_v61 = vpop.f32.mrf.mxu1 }
 0x197   :  { %311 = vst.msk [vmem:[%s608_s5 + $0x28] sm:$0xff] %vm36_vm1, %v293_v60  ;;  %v288_v62 = vadd.f32 %v328_v50, %v287_v61 }
 0x198   :  { %v419_v63 = vpop.f32.mrf.mxu1 }
 0x199   :  { %310 = vst.msk [vmem:[%s608_s5 + $0x20] sm:$0xff] %vm36_vm1, %v288_v62  ;;  %v303_v0 = vadd.f32 %v419_v63, %v328_v50 }
 0x19a   :  { %v297_v1 = vpop.f32.mrf.mxu1 }
 0x19b   :  { %313 = vst.msk [vmem:[%s608_s5 + $0x38] sm:$0xff] %vm36_vm1, %v303_v0  ;;  %v298_v2 = vadd.f32 %v328_v50, %v297_v1 }
 0x19d   :  { %312 = vst.msk [vmem:[%s608_s5 + $0x30] sm:$0xff] %vm36_vm1, %v298_v2 }

</bundles_post_ra>
